<compile_context>
chip_gen: v6e
topology: v6e:2x2x1
jax: 0.10.0
libtpu: 0.0.40
codegen_flags: <defaults>
</compile_context>

<pallas_src>
import functools

import jax
import jax.numpy as jnp
from jax import lax
from jax.experimental import pallas as pl
from jax.experimental.pallas import tpu as pltpu

# Lane indices of the packed per-slab statistics (row 0 of the (8,128) tile).
_BRIGHT_NUM, _BRIGHT_CNT, _BDIFF, _PHYS, _NB_CNT, _CONTENT, _GRAD_X, _GRAD_Y = range(8)
_CHUNK_TARGET_BYTES = 512 * 1024  # target f32 bytes per in-kernel chunk array


def _fsum(x):
    """Full reduction with an f32 accumulator (inputs may be bf16)."""
    return jnp.sum(x.astype(jnp.float32))


def _pack_stats(vals):
    """Pack {lane: scalar} into a lane-dense (1, 1, 8, 128) f32 tile (VPU selects)."""
    lane = lax.broadcasted_iota(jnp.int32, (1, 1, 8, 128), 3)
    acc = jnp.zeros((1, 1, 8, 128), jnp.float32)
    for i, v in vals.items():
        acc = acc + jnp.where(lane == i, v, jnp.float32(0.0))
    return acc


def _chunk_stats(pred_c, target_c, *, w, use_roll, do_grads):
    """Fused partial statistics for one (1, C, chunk, W) chunk.

    Elementwise math runs in the chunk's dtype (f32 or bf16); mask thresholds
    are evaluated in f32 for exactness; every reduction accumulates in f32.
    """
    f32 = jnp.float32
    _, c, ch, _ = pred_c.shape

    pred_b = jnp.max(pred_c, axis=1, keepdims=True)                   # (1,1,ch,w)
    target_b = jnp.max(target_c, axis=1, keepdims=True).astype(f32)   # exact thresholds
    bright_mask = (target_b > 0.8).astype(f32)
    nb_mask = (target_b < 0.5).astype(f32)
    diff = pred_c - target_c

    stats = {
        _BRIGHT_NUM: _fsum(pred_b * bright_mask),
        _BRIGHT_CNT: jnp.sum(bright_mask),
        # mean(pred_b) - 0.9*mean(target_b) == mean(pred_b - 0.9*target_b)
        _BDIFF: _fsum(pred_b - 0.9 * target_b),
        # relu(pred-target) + 0.1*(relu(pred-1) + relu(-pred)) fused into one map
        _PHYS: _fsum(jnp.maximum(diff, 0.0)
                     + 0.1 * (jnp.maximum(pred_c - 1.0, 0.0)
                              + jnp.maximum(-pred_c, 0.0))),
        _NB_CNT: jnp.sum(nb_mask),
        # |pred*m - target*m| == |diff|*m for a {0,1} mask; channel-sum first.
        _CONTENT: jnp.sum(jnp.sum(jnp.abs(diff), axis=1, keepdims=True)
                          .astype(f32) * nb_mask),
    }

    if do_grads:
        pred_f = pred_c.astype(f32)
        if use_roll:
            # Lane-dense 2-D view + XLU lane roll (no large shifted-slice temps);
            # convention-proof wrap correction.
            x2 = pred_f.reshape(c * ch, w)
            stats[_GRAD_X] = (
                _fsum(jnp.abs(pltpu.roll(x2, shift=w - 1, axis=1) - x2))
                - _fsum(jnp.abs(x2[:, 0:1] - x2[:, w - 1:w])))
        else:
            stats[_GRAD_X] = _fsum(jnp.abs(pred_f[:, :, :, 1:]
                                           - pred_f[:, :, :, :-1]))
        if ch > 1:
            # grad_y within the chunk; temporaries are only chunk-sized (the
            # chunk loop bounds the working set).  Cross-chunk / cross-slab row
            # pairs are added by the caller.
            stats[_GRAD_Y] = _fsum(jnp.abs(pred_f[:, :, 1:, :]
                                           - pred_f[:, :, :-1, :]))
        else:
            stats[_GRAD_Y] = jnp.float32(0.0)

    return _pack_stats(stats)


def _stats_kernel(*refs, th, chunk, w, compute_dtype, do_grads, use_roll,
                  has_boundary):
    if has_boundary:
        pred_ref, target_ref, next_ref, out_ref = refs
    else:
        pred_ref, target_ref, out_ref = refs
        next_ref = None

    nchunks = th // chunk

    if nchunks == 1:
        acc = _chunk_stats(pred_ref[...].astype(compute_dtype),
                           target_ref[...].astype(compute_dtype),
                           w=w, use_roll=use_roll, do_grads=do_grads)
    else:
        def body(k, carry):
            start = pl.multiple_of(k * chunk, chunk)
            p = pred_ref[:, :, pl.ds(start, chunk), :].astype(compute_dtype)
            t = target_ref[:, :, pl.ds(start, chunk), :].astype(compute_dtype)
            return carry + _chunk_stats(p, t, w=w, use_roll=use_roll,
                                        do_grads=do_grads)

        acc = lax.fori_loop(0, nchunks, body,
                            jnp.zeros((1, 1, 8, 128), jnp.float32))

        if do_grads:
            # grad_y pairs across internal chunk boundaries (tiny static slices).
            extra = jnp.float32(0.0)
            for kk in range(1, nchunks):
                r = kk * chunk
                prev_row = pred_ref[:, :, r - 1:r, :].astype(jnp.float32)
                cur_row = pred_ref[:, :, r:r + 1, :].astype(jnp.float32)
                extra = extra + jnp.sum(jnp.abs(cur_row - prev_row))
            acc = acc + _pack_stats({_GRAD_Y: extra})

    if has_boundary and do_grads:
        # grad_y pair between this slab's last row and the next slab's first row
        # (works for both within-split and split-boundary neighbours).
        g = pl.program_id(1) * pl.num_programs(2) + pl.program_id(2)
        num_h = pl.num_programs(1) * pl.num_programs(2)
        not_last = (g < num_h - 1).astype(jnp.float32)
        nxt_first = next_ref[:, :, 0:1, :].astype(jnp.float32)
        slab_last = pred_ref[:, :, th - 1:th, :].astype(jnp.float32)
        acc = acc + _pack_stats(
            {_GRAD_Y: not_last * jnp.sum(jnp.abs(nxt_first - slab_last))})

    # Accumulate across the H (reduction) grid axis into the resident out block.
    @pl.when(pl.program_id(2) == 0)
    def _():
        out_ref[...] = jnp.zeros_like(out_ref)

    out_ref[...] += acc


def _device_kind():
    try:
        return jax.devices()[0].device_kind.lower()
    except Exception:
        return ""


def _vmem_capacity_bytes(kind):
    try:
        return int(pltpu.get_tpu_info().vmem_capacity_bytes)
    except Exception:
        return (64 if "v7" in kind else 128) * 1024 * 1024


def _choose_tile_h(C, H, W, itemsize, sub, budget_bytes):
    """Largest H-slab that divides H, respects sublane packing and the budget."""
    if C * H * W * itemsize <= budget_bytes:
        return H
    th = (H // sub) * sub
    while th >= sub:
        if H % th == 0 and C * th * W * itemsize <= budget_bytes:
            return th
        th -= sub
    # TODO(synk): ragged H (no sublane-aligned divisor fits the budget); fall
    # back to one whole-H slab instead of implementing ragged-tail masking.
    return H


def _choose_chunk_rows(C, th, W, sub, target_bytes):
    """Rows per inner chunk; bounds the kernel's f32 working set."""
    if th <= sub or th % sub != 0 or C * th * W * 4 <= target_bytes:
        return th
    best = sub
    ch = sub
    while ch <= th:
        if th % ch == 0 and C * ch * W * 4 <= target_bytes:
            best = ch
        ch += sub
    return best


def unsupervised_flare_removal_loss(
        pred, target, *,
        loss_weight=1.0, light_weight=0.3, physics_weight=0.4,
        smooth_weight=0.2, content_weight=0.1,
        tile_h=None, chunk_rows=None, h_split=None, compute_dtype=None,
        tile_budget_bytes=None, vmem_limit_bytes=None):
    """JAX/Pallas equivalent of UnsupervisedFlareRemovalLoss.forward (NCHW)."""
    if pred.shape != target.shape:
        if pred.shape[-2:] != target.shape[-2:]:
            # TODO(synk): F.interpolate(bilinear) fallback not implemented.
            raise NotImplementedError(
                "spatial-size-mismatch fallback (bilinear resize) not implemented")
        if pred.shape[1] != target.shape[1]:
            mc = min(pred.shape[1], target.shape[1])
            pred, target = pred[:, :mc], target[:, :mc]

    N, C, H, W = pred.shape
    kind = _device_kind()
    itemsizes = (jnp.dtype(pred.dtype).itemsize, jnp.dtype(target.dtype).itemsize)
    # Sublane packing of the *narrowest* input dtype (8 f32, 16 bf16, 32 int8).
    sub = max(8, 32 // max(min(itemsizes), 1))

    if compute_dtype is None:
        both_bf16 = (pred.dtype == jnp.bfloat16) and (target.dtype == jnp.bfloat16)
        pre_v6 = any(t in kind for t in ("v2", "v3", "v4", "v5"))  # no bf16 VPU
        compute_dtype = jnp.bfloat16 if (both_bf16 and not pre_v6) else jnp.float32

    # Generation-aware VMEM sizing.  2 inputs x 2 pipeline buffers + halo +
    # chunk-bounded f32 scratch must fit under the scoped limit.
    capacity = _vmem_capacity_bytes(kind)
    if vmem_limit_bytes is None:
        vmem_limit_bytes = int(min(96 << 20, max(32 << 20, capacity // 2)))
    if tile_budget_bytes is None:
        tile_budget_bytes = int(max(1 << 20,
                                    min(16 << 20,
                                        (vmem_limit_bytes - (2 << 20)) // 5)))

    itemsize = max(itemsizes)
    if tile_h is None:
        th = _choose_tile_h(C, H, W, itemsize, sub, tile_budget_bytes)
    else:
        th = int(tile_h)
        if th <= 0 or H % th != 0 or (th != H and th % sub != 0):
            raise ValueError(
                f"tile_h={th} must divide H={H} and be a multiple of {sub}")
    num_h = H // th

    # Guard for the whole-H fallback: make sure pipeline buffers still fit.
    slab_bytes = C * th * W * sum(itemsizes)
    needed = 2 * slab_bytes + (6 << 20)
    if needed > vmem_limit_bytes:
        vmem_limit_bytes = int(min(max(capacity - (2 << 20), vmem_limit_bytes),
                                   needed))

    if chunk_rows is None:
        chunk = _choose_chunk_rows(C, th, W, sub, _CHUNK_TARGET_BYTES)
    else:
        chunk = int(chunk_rows)
        if chunk <= 0 or th % chunk != 0 or (chunk != th and chunk % sub != 0):
            raise ValueError(
                f"chunk_rows={chunk} must divide tile_h={th} and be a multiple of {sub}")

    if h_split is None:
        multi_tc = any(t in kind for t in ("v4", "v5p", "v7"))  # 2 TensorCores
        n_split = 2 if (multi_tc and N == 1 and num_h >= 2 and num_h % 2 == 0) else 1
    else:
        n_split = int(h_split)
        if n_split < 1 or num_h % n_split != 0:
            raise ValueError(f"h_split={n_split} must divide num_h={num_h}")
    hps = num_h // n_split

    do_grads = H > 1 and W > 1
    has_boundary = (num_h > 1) and do_grads
    use_roll = do_grads and (W % 128 == 0) and (chunk % 8 == 0)

    slab_map = lambda n, s, h: (n, 0, s * hps + h, 0)
    in_specs = [pl.BlockSpec((1, C, th, W), slab_map),
                pl.BlockSpec((1, C, th, W), slab_map)]
    inputs = [pred, target]
    if has_boundary:
        hb = H // sub     # sub-row blocks along H
        bps = th // sub   # sub-row blocks per slab
        next_map = lambda n, s, h: (
            n, 0, jnp.minimum((s * hps + h + 1) * bps, hb - 1), 0)
        in_specs.append(pl.BlockSpec((1, C, sub, W), next_map))
        inputs.append(pred)   # small halo: first rows of the next slab

    kernel = functools.partial(
        _stats_kernel, th=th, chunk=chunk, w=W, compute_dtype=compute_dtype,
        do_grads=do_grads, use_roll=use_roll, has_boundary=has_boundary)

    partials = pl.pallas_call(
        kernel,
        grid=(N, n_split, hps),
        in_specs=in_specs,
        out_specs=pl.BlockSpec((1, 1, 8, 128), lambda n, s, h: (n, s, 0, 0)),
        out_shape=jax.ShapeDtypeStruct((N, n_split, 8, 128), jnp.float32),
        compiler_params=pltpu.CompilerParams(
            dimension_semantics=("parallel", "parallel", "arbitrary"),
            vmem_limit_bytes=int(vmem_limit_bytes)),
    )(*inputs)

    # -------- finalize on the global sums (a handful of scalar ops) --------
    stats = jnp.sum(partials, axis=(0, 1))[0]     # (128,) f32
    n_b = float(N * H * W)        # elements of the per-pixel brightness maps
    n_all = float(N * C * H * W)  # elements of the full tensors

    light_loss = (jnp.where(stats[_BRIGHT_CNT] > 0.0, stats[_BRIGHT_NUM] / n_b, 0.0)
                  + jnp.maximum(stats[_BDIFF] / n_b, 0.0))
    physics_loss = stats[_PHYS] / n_all
    if do_grads:
        smooth_loss = (stats[_GRAD_X] / float(N * C * H * (W - 1))
                       + stats[_GRAD_Y] / float(N * C * (H - 1) * W))
    else:
        smooth_loss = jnp.float32(0.0)
    content_loss = jnp.where(stats[_NB_CNT] > 0.0, stats[_CONTENT] / n_all, 0.0)

    total = (light_weight * light_loss + physics_weight * physics_loss
             + smooth_weight * smooth_loss + content_weight * content_loss)
    # Scalar loss returned in f32 (avoids a lossy bf16 downcast of the result).
    return (total * loss_weight).astype(jnp.float32)


def _reference_loss(pred, target, *, loss_weight=1.0, light_weight=0.3,
                    physics_weight=0.4, smooth_weight=0.2, content_weight=0.1):
    """Plain-JAX reference (mirrors the PyTorch module, f32 math)."""
    pred = pred.astype(jnp.float32)
    target = target.astype(jnp.float32)
    pred_b = jnp.max(pred, axis=1, keepdims=True)
    target_b = jnp.max(target, axis=1, keepdims=True)
    bright_mask = (target_b > 0.8).astype(jnp.float32)
    bright_sup = jnp.where(bright_mask.sum() > 0,
                           (pred_b * bright_mask).mean(), 0.0)
    light = bright_sup + jax.nn.relu(pred_b.mean() - target_b.mean() * 0.9)
    physics = (jax.nn.relu(pred - target).mean()
               + 0.1 * (jax.nn.relu(pred - 1.0).mean()
                        + jax.nn.relu(-pred).mean()))
    smooth = (jnp.abs(pred[:, :, :, 1:] - pred[:, :, :, :-1]).mean()
              + jnp.abs(pred[:, :, 1:, :] - pred[:, :, :-1, :]).mean())
    non_bright = (target_b < 0.5).astype(jnp.float32)
    content = jnp.where(non_bright.sum() > 0,
                        jnp.abs(pred * non_bright - target * non_bright).mean(),
                        0.0)
    total = (light_weight * light + physics_weight * physics
             + smooth_weight * smooth + content_weight * content)
    return total * loss_weight


if __name__ == "__main__":
    key = jax.random.PRNGKey(0)
    k1, k2, k3, k4, k5, k6 = jax.random.split(key, 6)

    # 1) small NCHW, whole-H slab (single chunk, slice-based grads since W=16).
    pred = jax.random.uniform(k1, (2, 4, 16, 16), dtype=jnp.float32)
    target = jax.random.uniform(k2, (2, 4, 16, 16), dtype=jnp.float32)
    ref = _reference_loss(pred, target)
    out = jax.block_until_ready(
        jax.jit(unsupervised_flare_removal_loss)(pred, target))
    assert jnp.allclose(out, ref, atol=1e-5, rtol=1e-5), (out, ref)

    # 2) forced H-slab tiling (pipelined grid + cross-slab grad_y halo).
    out = jax.block_until_ready(
        jax.jit(functools.partial(unsupervised_flare_removal_loss, tile_h=8))(
            pred, target))
    assert jnp.allclose(out, ref, atol=1e-5, rtol=1e-5), (out, ref)

    # 3) lane-dense W=128: roll-based grad_x + chunked inner fori loop + halo.
    pred3 = jax.random.uniform(k3, (2, 3, 32, 128), dtype=jnp.float32)
    target3 = jax.random.uniform(k4, (2, 3, 32, 128), dtype=jnp.float32)
    ref3 = _reference_loss(pred3, target3)
    out3 = jax.block_until_ready(
        jax.jit(functools.partial(unsupervised_flare_removal_loss,
                                  tile_h=16, chunk_rows=8))(pred3, target3))
    assert jnp.allclose(out3, ref3, atol=1e-5, rtol=1e-5), (out3, ref3)

    # 4) N=1 with forced 2-way H split (v7x megacore path), halo at split edge.
    pred4 = jax.random.uniform(k5, (1, 3, 32, 128), dtype=jnp.float32)
    target4 = jax.random.uniform(k6, (1, 3, 32, 128), dtype=jnp.float32)
    ref4 = _reference_loss(pred4, target4)
    out4 = jax.block_until_ready(
        jax.jit(functools.partial(unsupervised_flare_removal_loss,
                                  tile_h=8, h_split=2))(pred4, target4))
    assert jnp.allclose(out4, ref4, atol=1e-5, rtol=1e-5), (out4, ref4)

    # 5) bf16 inputs: bf16 elementwise math (v6e+) with f32 masks/accumulators.
    pred5 = pred3.astype(jnp.bfloat16)
    target5 = target3.astype(jnp.bfloat16)
    ref5 = _reference_loss(pred5, target5)
    out5 = jax.block_until_ready(
        jax.jit(functools.partial(unsupervised_flare_removal_loss, tile_h=16))(
            pred5, target5))
    assert jnp.allclose(out5, ref5, atol=1e-2, rtol=2e-2), (out5, ref5)

    print("KERNEL_OK")
</pallas_src>

<mosaic_0001>
module attributes {stable_mosaic.version = 11 : i64} {
  func.func @_stats_kernel(%arg0: i32, %arg1: i32, %arg2: i32, %arg3: memref<1x4x16x16xf32, #tpu.memory_space<vmem>>, %arg4: memref<1x4x16x16xf32, #tpu.memory_space<vmem>>, %arg5: memref<1x1x8x128xf32, #tpu.memory_space<vmem>>) attributes {dimension_semantics = [#tpu.dimension_semantics<parallel>, #tpu.dimension_semantics<parallel>, #tpu.dimension_semantics<arbitrary>], iteration_bounds = array<i64: 2, 1, 1>, scalar_prefetch = 0 : i64, scratch_operands = 0 : i64, tpu.core_type = #tpu.core_type<tc>, window_params = [{transform_indices = @transform_0, window_bounds = array<i64: 1, 4, 16, 16>}, {transform_indices = @transform_1, window_bounds = array<i64: 1, 4, 16, 16>}, {transform_indices = @transform_2, window_bounds = array<i64: 1, 1, 8, 128>}]} {
    %c0 = arith.constant 0 : index
    %c0_0 = arith.constant 0 : index
    %c0_1 = arith.constant 0 : index
    %c0_2 = arith.constant 0 : index
    %0 = vector.load %arg3[%c0, %c0_0, %c0_1, %c0_2] : memref<1x4x16x16xf32, #tpu.memory_space<vmem>>, vector<1x4x16x16xf32>
    %c0_3 = arith.constant 0 : index
    %c0_4 = arith.constant 0 : index
    %c0_5 = arith.constant 0 : index
    %c0_6 = arith.constant 0 : index
    %1 = vector.load %arg4[%c0_3, %c0_4, %c0_5, %c0_6] : memref<1x4x16x16xf32, #tpu.memory_space<vmem>>, vector<1x4x16x16xf32>
    %cst = arith.constant dense<0xFF800000> : vector<1x16x16xf32>
    %2 = vector.multi_reduction <maximumf>, %0, %cst [1] : vector<1x4x16x16xf32> to vector<1x16x16xf32>
    %3 = vector.shape_cast %2 : vector<1x16x16xf32> to vector<1x1x16x16xf32>
    %cst_7 = arith.constant dense<0xFF800000> : vector<1x16x16xf32>
    %4 = vector.multi_reduction <maximumf>, %1, %cst_7 [1] : vector<1x4x16x16xf32> to vector<1x16x16xf32>
    %5 = vector.shape_cast %4 : vector<1x16x16xf32> to vector<1x1x16x16xf32>
    %cst_8 = arith.constant 8.000000e-01 : f32
    %6 = vector.broadcast %cst_8 : f32 to vector<1x1x16x16xf32>
    %7 = arith.cmpf ogt, %5, %6 : vector<1x1x16x16xf32>
    %8 = arith.extui %7 : vector<1x1x16x16xi1> to vector<1x1x16x16xi32>
    %9 = arith.sitofp %8 : vector<1x1x16x16xi32> to vector<1x1x16x16xf32>
    %cst_9 = arith.constant 5.000000e-01 : f32
    %10 = vector.broadcast %cst_9 : f32 to vector<1x1x16x16xf32>
    %11 = arith.cmpf olt, %5, %10 : vector<1x1x16x16xf32>
    %12 = arith.extui %11 : vector<1x1x16x16xi1> to vector<1x1x16x16xi32>
    %13 = arith.sitofp %12 : vector<1x1x16x16xi32> to vector<1x1x16x16xf32>
    %14 = arith.subf %0, %1 : vector<1x4x16x16xf32>
    %15 = arith.mulf %3, %9 : vector<1x1x16x16xf32>
    %16 = vector.shape_cast %15 : vector<1x1x16x16xf32> to vector<1x1x1x16x16xf32>
    %cst_10 = arith.constant dense<0.000000e+00> : vector<1xf32>
    %17 = vector.multi_reduction <add>, %16, %cst_10 [1, 2, 3, 4] : vector<1x1x1x16x16xf32> to vector<1xf32>
    %18 = vector.shape_cast %17 : vector<1xf32> to vector<1x1x1x1x1xf32>
    %19 = vector.extract %18[0, 0, 0, 0, 0] : f32 from vector<1x1x1x1x1xf32>
    %20 = vector.shape_cast %9 : vector<1x1x16x16xf32> to vector<1x1x1x16x16xf32>
    %cst_11 = arith.constant dense<0.000000e+00> : vector<1xf32>
    %21 = vector.multi_reduction <add>, %20, %cst_11 [1, 2, 3, 4] : vector<1x1x1x16x16xf32> to vector<1xf32>
    %22 = vector.shape_cast %21 : vector<1xf32> to vector<1x1x1x1x1xf32>
    %23 = vector.extract %22[0, 0, 0, 0, 0] : f32 from vector<1x1x1x1x1xf32>
    %cst_12 = arith.constant 0.899999976 : f32
    %24 = vector.broadcast %cst_12 : f32 to vector<1x1x16x16xf32>
    %25 = arith.mulf %24, %5 : vector<1x1x16x16xf32>
    %26 = arith.subf %3, %25 : vector<1x1x16x16xf32>
    %27 = vector.shape_cast %26 : vector<1x1x16x16xf32> to vector<1x1x1x16x16xf32>
    %cst_13 = arith.constant dense<0.000000e+00> : vector<1xf32>
    %28 = vector.multi_reduction <add>, %27, %cst_13 [1, 2, 3, 4] : vector<1x1x1x16x16xf32> to vector<1xf32>
    %29 = vector.shape_cast %28 : vector<1xf32> to vector<1x1x1x1x1xf32>
    %30 = vector.extract %29[0, 0, 0, 0, 0] : f32 from vector<1x1x1x1x1xf32>
    %cst_14 = arith.constant 0.000000e+00 : f32
    %31 = vector.broadcast %cst_14 : f32 to vector<1x4x16x16xf32>
    %32 = arith.maximumf %14, %31 : vector<1x4x16x16xf32>
    %cst_15 = arith.constant 1.000000e+00 : f32
    %33 = vector.broadcast %cst_15 : f32 to vector<1x4x16x16xf32>
    %34 = arith.subf %0, %33 : vector<1x4x16x16xf32>
    %cst_16 = arith.constant 0.000000e+00 : f32
    %35 = vector.broadcast %cst_16 : f32 to vector<1x4x16x16xf32>
    %36 = arith.maximumf %34, %35 : vector<1x4x16x16xf32>
    %cst_17 = arith.constant 0.000000e+00 : f32
    %37 = vector.broadcast %cst_17 : f32 to vector<1x4x16x16xf32>
    %38 = arith.subf %37, %0 : vector<1x4x16x16xf32>
    %cst_18 = arith.constant 0.000000e+00 : f32
    %39 = vector.broadcast %cst_18 : f32 to vector<1x4x16x16xf32>
    %40 = arith.maximumf %38, %39 : vector<1x4x16x16xf32>
    %41 = arith.addf %36, %40 : vector<1x4x16x16xf32>
    %cst_19 = arith.constant 1.000000e-01 : f32
    %42 = vector.broadcast %cst_19 : f32 to vector<1x4x16x16xf32>
    %43 = arith.mulf %42, %41 : vector<1x4x16x16xf32>
    %44 = arith.addf %32, %43 : vector<1x4x16x16xf32>
    %45 = vector.shape_cast %44 : vector<1x4x16x16xf32> to vector<1x1x4x16x16xf32>
    %cst_20 = arith.constant dense<0.000000e+00> : vector<1xf32>
    %46 = vector.multi_reduction <add>, %45, %cst_20 [1, 2, 3, 4] : vector<1x1x4x16x16xf32> to vector<1xf32>
    %47 = vector.shape_cast %46 : vector<1xf32> to vector<1x1x1x1x1xf32>
    %48 = vector.extract %47[0, 0, 0, 0, 0] : f32 from vector<1x1x1x1x1xf32>
    %49 = vector.shape_cast %13 : vector<1x1x16x16xf32> to vector<1x1x1x16x16xf32>
    %cst_21 = arith.constant dense<0.000000e+00> : vector<1xf32>
    %50 = vector.multi_reduction <add>, %49, %cst_21 [1, 2, 3, 4] : vector<1x1x1x16x16xf32> to vector<1xf32>
    %51 = vector.shape_cast %50 : vector<1xf32> to vector<1x1x1x1x1xf32>
    %52 = vector.extract %51[0, 0, 0, 0, 0] : f32 from vector<1x1x1x1x1xf32>
    %53 = math.absf %14 : vector<1x4x16x16xf32>
    %cst_22 = arith.constant dense<0.000000e+00> : vector<1x16x16xf32>
    %54 = vector.multi_reduction <add>, %53, %cst_22 [1] : vector<1x4x16x16xf32> to vector<1x16x16xf32>
    %55 = vector.shape_cast %54 : vector<1x16x16xf32> to vector<1x1x16x16xf32>
    %56 = arith.mulf %55, %13 : vector<1x1x16x16xf32>
    %57 = vector.shape_cast %56 : vector<1x1x16x16xf32> to vector<1x1x1x16x16xf32>
    %cst_23 = arith.constant dense<0.000000e+00> : vector<1xf32>
    %58 = vector.multi_reduction <add>, %57, %cst_23 [1, 2, 3, 4] : vector<1x1x1x16x16xf32> to vector<1xf32>
    %59 = vector.shape_cast %58 : vector<1xf32> to vector<1x1x1x1x1xf32>
    %60 = vector.extract %59[0, 0, 0, 0, 0] : f32 from vector<1x1x1x1x1xf32>
    %61 = vector.extract_strided_slice %0 {offsets = [0, 0, 0, 1], sizes = [1, 4, 16, 15], strides = [1, 1, 1, 1]} : vector<1x4x16x16xf32> to vector<1x4x16x15xf32>
    %62 = vector.extract_strided_slice %0 {offsets = [0, 0, 0, 0], sizes = [1, 4, 16, 15], strides = [1, 1, 1, 1]} : vector<1x4x16x16xf32> to vector<1x4x16x15xf32>
    %63 = arith.subf %61, %62 : vector<1x4x16x15xf32>
    %64 = math.absf %63 : vector<1x4x16x15xf32>
    %65 = vector.shape_cast %64 : vector<1x4x16x15xf32> to vector<1x1x4x16x15xf32>
    %cst_24 = arith.constant dense<0.000000e+00> : vector<1xf32>
    %66 = vector.multi_reduction <add>, %65, %cst_24 [1, 2, 3, 4] : vector<1x1x4x16x15xf32> to vector<1xf32>
    %67 = vector.shape_cast %66 : vector<1xf32> to vector<1x1x1x1x1xf32>
    %68 = vector.extract %67[0, 0, 0, 0, 0] : f32 from vector<1x1x1x1x1xf32>
    %69 = vector.extract_strided_slice %0 {offsets = [0, 0, 1, 0], sizes = [1, 4, 15, 16], strides = [1, 1, 1, 1]} : vector<1x4x16x16xf32> to vector<1x4x15x16xf32>
    %70 = vector.extract_strided_slice %0 {offsets = [0, 0, 0, 0], sizes = [1, 4, 15, 16], strides = [1, 1, 1, 1]} : vector<1x4x16x16xf32> to vector<1x4x15x16xf32>
    %71 = arith.subf %69, %70 : vector<1x4x15x16xf32>
    %72 = math.absf %71 : vector<1x4x15x16xf32>
    %73 = vector.shape_cast %72 : vector<1x4x15x16xf32> to vector<1x1x4x15x16xf32>
    %cst_25 = arith.constant dense<0.000000e+00> : vector<1xf32>
    %74 = vector.multi_reduction <add>, %73, %cst_25 [1, 2, 3, 4] : vector<1x1x4x15x16xf32> to vector<1xf32>
    %75 = vector.shape_cast %74 : vector<1xf32> to vector<1x1x1x1x1xf32>
    %76 = vector.extract %75[0, 0, 0, 0, 0] : f32 from vector<1x1x1x1x1xf32>
    %77 = tpu.iota {dimensions = array<i32: 3>} : vector<1x1x8x128xi32>
    %cst_26 = arith.constant 0.000000e+00 : f32
    %78 = vector.broadcast %cst_26 : f32 to vector<1x1x8x128xf32>
    %c0_i32 = arith.constant 0 : i32
    %79 = vector.broadcast %c0_i32 : i32 to vector<1x1x8x128xi32>
    %80 = arith.cmpi eq, %77, %79 : vector<1x1x8x128xi32>
    %cst_27 = arith.constant 0.000000e+00 : f32
    %81 = vector.broadcast %19 : f32 to vector<1x1x8x128xf32>
    %82 = vector.broadcast %cst_27 : f32 to vector<1x1x8x128xf32>
    %83 = arith.select %80, %81, %82 : vector<1x1x8x128xi1>, vector<1x1x8x128xf32>
    %84 = arith.addf %78, %83 : vector<1x1x8x128xf32>
    %c1_i32 = arith.constant 1 : i32
    %85 = vector.broadcast %c1_i32 : i32 to vector<1x1x8x128xi32>
    %86 = arith.cmpi eq, %77, %85 : vector<1x1x8x128xi32>
    %cst_28 = arith.constant 0.000000e+00 : f32
    %87 = vector.broadcast %23 : f32 to vector<1x1x8x128xf32>
    %88 = vector.broadcast %cst_28 : f32 to vector<1x1x8x128xf32>
    %89 = arith.select %86, %87, %88 : vector<1x1x8x128xi1>, vector<1x1x8x128xf32>
    %90 = arith.addf %84, %89 : vector<1x1x8x128xf32>
    %c2_i32 = arith.constant 2 : i32
    %91 = vector.broadcast %c2_i32 : i32 to vector<1x1x8x128xi32>
    %92 = arith.cmpi eq, %77, %91 : vector<1x1x8x128xi32>
    %cst_29 = arith.constant 0.000000e+00 : f32
    %93 = vector.broadcast %30 : f32 to vector<1x1x8x128xf32>
    %94 = vector.broadcast %cst_29 : f32 to vector<1x1x8x128xf32>
    %95 = arith.select %92, %93, %94 : vector<1x1x8x128xi1>, vector<1x1x8x128xf32>
    %96 = arith.addf %90, %95 : vector<1x1x8x128xf32>
    %c3_i32 = arith.constant 3 : i32
    %97 = vector.broadcast %c3_i32 : i32 to vector<1x1x8x128xi32>
    %98 = arith.cmpi eq, %77, %97 : vector<1x1x8x128xi32>
    %cst_30 = arith.constant 0.000000e+00 : f32
    %99 = vector.broadcast %48 : f32 to vector<1x1x8x128xf32>
    %100 = vector.broadcast %cst_30 : f32 to vector<1x1x8x128xf32>
    %101 = arith.select %98, %99, %100 : vector<1x1x8x128xi1>, vector<1x1x8x128xf32>
    %102 = arith.addf %96, %101 : vector<1x1x8x128xf32>
    %c4_i32 = arith.constant 4 : i32
    %103 = vector.broadcast %c4_i32 : i32 to vector<1x1x8x128xi32>
    %104 = arith.cmpi eq, %77, %103 : vector<1x1x8x128xi32>
    %cst_31 = arith.constant 0.000000e+00 : f32
    %105 = vector.broadcast %52 : f32 to vector<1x1x8x128xf32>
    %106 = vector.broadcast %cst_31 : f32 to vector<1x1x8x128xf32>
    %107 = arith.select %104, %105, %106 : vector<1x1x8x128xi1>, vector<1x1x8x128xf32>
    %108 = arith.addf %102, %107 : vector<1x1x8x128xf32>
    %c5_i32 = arith.constant 5 : i32
    %109 = vector.broadcast %c5_i32 : i32 to vector<1x1x8x128xi32>
    %110 = arith.cmpi eq, %77, %109 : vector<1x1x8x128xi32>
    %cst_32 = arith.constant 0.000000e+00 : f32
    %111 = vector.broadcast %60 : f32 to vector<1x1x8x128xf32>
    %112 = vector.broadcast %cst_32 : f32 to vector<1x1x8x128xf32>
    %113 = arith.select %110, %111, %112 : vector<1x1x8x128xi1>, vector<1x1x8x128xf32>
    %114 = arith.addf %108, %113 : vector<1x1x8x128xf32>
    %c6_i32 = arith.constant 6 : i32
    %115 = vector.broadcast %c6_i32 : i32 to vector<1x1x8x128xi32>
    %116 = arith.cmpi eq, %77, %115 : vector<1x1x8x128xi32>
    %cst_33 = arith.constant 0.000000e+00 : f32
    %117 = vector.broadcast %68 : f32 to vector<1x1x8x128xf32>
    %118 = vector.broadcast %cst_33 : f32 to vector<1x1x8x128xf32>
    %119 = arith.select %116, %117, %118 : vector<1x1x8x128xi1>, vector<1x1x8x128xf32>
    %120 = arith.addf %114, %119 : vector<1x1x8x128xf32>
    %c7_i32 = arith.constant 7 : i32
    %121 = vector.broadcast %c7_i32 : i32 to vector<1x1x8x128xi32>
    %122 = arith.cmpi eq, %77, %121 : vector<1x1x8x128xi32>
    %cst_34 = arith.constant 0.000000e+00 : f32
    %123 = vector.broadcast %76 : f32 to vector<1x1x8x128xf32>
    %124 = vector.broadcast %cst_34 : f32 to vector<1x1x8x128xf32>
    %125 = arith.select %122, %123, %124 : vector<1x1x8x128xi1>, vector<1x1x8x128xf32>
    %126 = arith.addf %120, %125 : vector<1x1x8x128xf32>
    %c0_i32_35 = arith.constant 0 : i32
    %127 = arith.cmpi eq, %arg2, %c0_i32_35 : i32
    %128 = arith.extui %127 : i1 to i32
    %c0_i32_36 = arith.constant 0 : i32
    %129 = arith.cmpi ne, %128, %c0_i32_36 : i32
    scf.if %129 {
      %cst_45 = arith.constant 0.000000e+00 : f32
      %133 = vector.broadcast %cst_45 : f32 to vector<1x1x8x128xf32>
      %c0_46 = arith.constant 0 : index
      %c0_47 = arith.constant 0 : index
      %c0_48 = arith.constant 0 : index
      %c0_49 = arith.constant 0 : index
      %134 = vector.load %arg5[%c0_46, %c0_47, %c0_48, %c0_49] : memref<1x1x8x128xf32, #tpu.memory_space<vmem>>, vector<1x1x8x128xf32>
      tpu.vector_store %arg5[%c0_46, %c0_47, %c0_48, %c0_49], %133 {strides = array<i32>} : memref<1x1x8x128xf32, #tpu.memory_space<vmem>>, vector<1x1x8x128xf32>,
    } else {
    }
    %c0_37 = arith.constant 0 : index
    %c0_38 = arith.constant 0 : index
    %c0_39 = arith.constant 0 : index
    %c0_40 = arith.constant 0 : index
    %130 = vector.load %arg5[%c0_37, %c0_38, %c0_39, %c0_40] : memref<1x1x8x128xf32, #tpu.memory_space<vmem>>, vector<1x1x8x128xf32>
    %131 = arith.addf %130, %126 : vector<1x1x8x128xf32>
    %c0_41 = arith.constant 0 : index
    %c0_42 = arith.constant 0 : index
    %c0_43 = arith.constant 0 : index
    %c0_44 = arith.constant 0 : index
    %132 = vector.load %arg5[%c0_41, %c0_42, %c0_43, %c0_44] : memref<1x1x8x128xf32, #tpu.memory_space<vmem>>, vector<1x1x8x128xf32>
    tpu.vector_store %arg5[%c0_41, %c0_42, %c0_43, %c0_44], %131 {strides = array<i32>} : memref<1x1x8x128xf32, #tpu.memory_space<vmem>>, vector<1x1x8x128xf32>,
    return
  }
  func.func @transform_0(%arg0: i32, %arg1: i32, %arg2: i32) -> (i32, i32, i32, i32) {
    %c1_i32 = arith.constant 1 : i32
    %0 = arith.muli %arg1, %c1_i32 : i32
    %1 = arith.addi %0, %arg2 : i32
    %c0_i32 = arith.constant 0 : i32
    %c0_i32_0 = arith.constant 0 : i32
    %c0_i32_1 = arith.constant 0 : i32
    return %arg0, %c0_i32, %1, %c0_i32_0 : i32, i32, i32, i32
  }
  func.func @transform_1(%arg0: i32, %arg1: i32, %arg2: i32) -> (i32, i32, i32, i32) {
    %c1_i32 = arith.constant 1 : i32
    %0 = arith.muli %arg1, %c1_i32 : i32
    %1 = arith.addi %0, %arg2 : i32
    %c0_i32 = arith.constant 0 : i32
    %c0_i32_0 = arith.constant 0 : i32
    %c0_i32_1 = arith.constant 0 : i32
    return %arg0, %c0_i32, %1, %c0_i32_0 : i32, i32, i32, i32
  }
  func.func @transform_2(%arg0: i32, %arg1: i32, %arg2: i32) -> (i32, i32, i32, i32) {
    %c0_i32 = arith.constant 0 : i32
    %c0_i32_0 = arith.constant 0 : i32
    %c0_i32_1 = arith.constant 0 : i32
    return %arg0, %arg1, %c0_i32, %c0_i32_0 : i32, i32, i32, i32
  }
}

</mosaic_0001>

<bundles_post_ra>
// kernel: unsupervised_flare_removal_loss.1
= control target key start
LH: loop header
LB: loop body
LE: loop exit
PB: predicated region body
PF: predicated region fallthrough
CT: control target
= control target key end

     0   :  { %7 = vsyncpa [#allocation3], 0  ;;  %s1467_s0 = inlined_call_operand.hbm [shape: f32[2,4,16,16], index: 0, kind: input, shape index: {}]   ;;  %s1468_s1 = inlined_call_operand.hbm [shape: f32[2,4,16,16], index: 1, kind: input, shape index: {}]   ;;  %s1469_s2 = inlined_call_operand.vmem [shape: f32[2,1,8,128], index: 2, kind: output, shape index: {}]  }
   0x1   :  { %9 = vsyncpa [#allocation3 + $0x1], 0 }
   0x2   :  { %10 = vsyncpa [#allocation5], 0 }
   0x3   :  { %12 = vsyncpa [#allocation5 + $0x1], 0  ;;  %s1090_s9 = smov 0   ;;  %s1092_s10 = smov 0  }
   0x4   :  { %s1094_s11 = smov 0   ;;  %s1096_s12 = smov 0  }
   0x5   :  { %s1098_s13 = smov 0   ;;  %s1100_s14 = smov 0  }
   0x6 LB: > { %s845_s15 = sadd.s32 4294967295, %s1066_s14   ;;  %s37_s16 = sadd.s32 1, %s1062_s13  ;;  %s1066_s14 = sphi %s1100_s14, %s18_s14   ;;  %s1062_s13 = sphi %s1098_s13, %s1478_s13   ;;  %s1058_s12 = sphi %s1096_s12, %s1477_s12   ;;  %s1054_s11 = sphi %s1094_s11, %s1476_s11   ;;  %s1050_s10 = sphi %s1092_s10, %s1475_s10   ;;  %s1046_s9 = sphi %s1090_s9, %s1474_s9  }
   0x7   : > { %p39_p0 = scmp.ge.s32.totalorder %s37_s16, 2  ;;  %s48_s17 = sadd.s32 1, %s1054_s11 }
   0x8   : > { %p55_p1 = scmp.ne.s32.totalorder %s1054_s11, %s1050_s10  ;;  %p56_p2 = scmp.eq.s32.totalorder %s1066_s14, 0 }
   0x9   : > { %s1480_s16 = smov (%p39_p0, %s37_s16), 0  ;;  %p61_p4 = scmp.ne.s32.totalorder %s1050_s10, %s1046_s9 }
   0xa   : > { %p1126_p3 = por %p56_p2, %p55_p1  ;;  %s43_s19 = ssub.s32 %s1062_s13, %s1480_s16 }
   0xb   : > { %p62_p5 = scmp.eq.s32.totalorder %s845_s15, 0  ;;  %p46_p6 = scmp.eq.s32.totalorder %s43_s19, 0 }
   0xc   : > { %p902_p8 = scmp.lt.s32.totalorder %s1066_s14, 2  ;;  %s1142_s22 = sand.u32 1, %s1054_s11  }
   0xd   : > { %p1133_p7 = por %p62_p5, %p61_p4  ;;  %s873_s23 = sshll.u32 %s1062_s13, 10 }
   0xe   : > { %s1139_s21 = scalar_select %p46_p6, %s1054_s11, %s48_s17  }
   0xf   : > { %s849_s24 = sshll.u32 %s1142_s22, 6  ;;  %s156_s27 = scalar_lea.hbm %s1467_s0, %s873_s23 }
  0x10   : > { %s147_s28 = scalar_lea.vmem [#allocation2], %s849_s24  ;;  %p1153_p9 = pnand %p902_p8, %p1126_p3 }
  0x11   : > { %s157_s29 = sshll.u32 %s147_s28, 4  ;;  %s144_s3 = scalar_lea.sflag [#allocation3], %s1142_s22  ;;  %s158_s29 = int_to_ptr.vmem [resolvable:$true] %s157_s29 }
  0x12   : > { %p958_p10 = pneg %p1153_p9  ;;  %s969_s4 = scalar_lea.vmem %s158_s29, 1024 }
  0x13   : > { %p970_p11 = scmp.ne.s32.totalorder %s158_s29, %s969_s4  ;;  %s1068_s5 = smov [#allocation2]  }
  0x14   : > { %s974_s6 = sshll.u32 %s1068_s5, 4  ;;  %s975_s6 = int_to_ptr.vmem [resolvable:$false] %s974_s6 }
  0x15   : > { %p972_p12 = pnand %p970_p11, %p958_p10  ;;  %s976_s7 = scalar_lea.vmem %s975_s6, 2048 }
  0x16   : > { %p977_p0 = scmp.lt.s32.totalorder %s158_s29, %s975_s6  ;;  %p978_p1 = scmp.lt.s32.totalorder %s976_s7, %s969_s4 }
  0x17   : > { %p973_p13 = pneg %p972_p12 }
  0x18   : > { %p979_p2 = por %p978_p1, %p977_p0 }
  0x1a   : > { %p980_p3 = pnand %p979_p2, %p973_p13 }
  0x1c   : > { %983 = shalt.err (!%p980_p3)
}
  0x1d   : > { %s1069_s8 = smov 128   ;;  %s1070_s9 = smov 8  }
  0x1e   : > { %898 = dma.hbm_to_vmem [thread:$0]  (!%p1153_p9), %s156_s27, 1024, %s158_s29, %s144_s3, %s1069_s8, %s1069_s8, %s1070_s9  }
  0x1f   : > { %p855_p4 = scmp.ge.s32.totalorder %s1066_s14, 1  ;;  %p189_p5 = scmp.lt.s32.totalorder %s1066_s14, 3 }
  0x20   : > { %s180_s19 = scalar_lea.hbm %s1468_s1, %s873_s23  ;;  %s171_s25 = scalar_lea.vmem [#allocation4], %s849_s24 }
  0x21   : > { %p1167_p6 = pnand %p855_p4, %p189_p5  ;;  %s181_s26 = sshll.u32 %s171_s25, 4  ;;  %s182_s26 = int_to_ptr.vmem [resolvable:$true] %s181_s26 }
  0x22   : > { %s168_s28 = scalar_lea.sflag [#allocation5], %s1142_s22  ;;  %s997_s4 = scalar_lea.vmem %s182_s26, 1024 }
  0x23   : > { %p998_p8 = scmp.ne.s32.totalorder %s182_s26, %s997_s4  ;;  %s1071_s27 = smov [#allocation4]  }
  0x24   : > { %s1002_s29 = sshll.u32 %s1071_s27, 4  ;;  %s1003_s29 = int_to_ptr.vmem [resolvable:$false] %s1002_s29 }
  0x25   : > { %p1000_p11 = pnand %p998_p8, %p958_p10  ;;  %s1004_s3 = scalar_lea.vmem %s1003_s29, 2048 }
  0x26   : > { %p1005_p13 = scmp.lt.s32.totalorder %s182_s26, %s1003_s29  ;;  %p1006_p0 = scmp.lt.s32.totalorder %s1004_s3, %s997_s4 }
  0x27   : > { %p1001_p12 = pneg %p1000_p11 }
  0x28   : > { %p1007_p1 = por %p1006_p0, %p1005_p13 }
  0x2a   : > { %p1008_p2 = pnand %p1007_p1, %p1001_p12 }
  0x2c   : > { %1011 = shalt.err (!%p1008_p2)
}
  0x2d   : > { %901 = dma.hbm_to_vmem [thread:$0]  (!%p1153_p9), %s180_s19, 1024, %s182_s26, %s168_s28, %s1069_s8, %s1069_s8, %s1070_s9  }
  0x2e   : > { %193 = sbr.rel (%p1167_p6) target bundleno = 515 (0x203), region = 28  ;;  %s195_s22 = sand.u32 (!%p1167_p6), 1, %s1050_s10  }
  0x2f   : > { %s856_s23 = sshll.u32 (!%p1167_p6), %s195_s22, 6  ;;  %s196_s24 = scalar_lea.sflag (!%p1167_p6), [#allocation3], %s195_s22 }
  0x30   : > { %s199_s5 = scalar_lea.vmem (!%p1167_p6), [#allocation2], %s856_s23 }
  0x33   : > { %1037 = dma.done.wait (%p1133_p7), %s196_s24, 1024  }
  0x34   : > { %1039 = vsyncadd (%p1133_p7), %s196_s24, 4294966272  ;;  %s205_s6 = scalar_lea.sflag [#allocation5], %s195_s22  ;;  %s208_s7 = scalar_lea.vmem [#allocation4], %s856_s23 }
  0x35   : > { %1041 = dma.done.wait (%p1133_p7), %s205_s6, 1024  }
  0x36   : > { %1043 = vsyncadd (%p1133_p7), %s205_s6, 4294966272  ;;  %v1193_v0 = vld [vmem:[%s199_s5] sm:$0xff]  ;;  %v1195_v1 = vld [vmem:[%s199_s5 + $0x10] sm:$0xff]  ;;  %s1072_s30 = smov 1   ;;  %vm263_vm0 = vcmask 130048   ;;  %v1073_v50 = vmov 0.0  }
  0x37   : > { %498 = vrot.lane.b32.xlu0 %v1193_v0, %s1072_s30  ;;  %502 = vrot.lane.b32.xlu1 %v1195_v1, %s1072_s30  ;;  %v1199_v2 = vld [vmem:[%s199_s5 + $0x8] sm:$0xff]  ;;  %v1201_v3 = vld [vmem:[%s199_s5 + $0x18] sm:$0xff]  ;;  %v264_v28 = vsel %vm263_vm0, %v1193_v0, -inf  ;;  %v265_v29 = vsel %vm263_vm0, %v1195_v1, -inf  ;;  %v863_v42 = vadd.f32 -1.0, %v1193_v0  ;;  %v378_v44 = vsub.f32 0.0, %v1193_v0 }
  0x38   : > { %v1205_v4 = vld [vmem:[%s199_s5 + $0x20] sm:$0xff]  ;;  %v1207_v5 = vld [vmem:[%s199_s5 + $0x28] sm:$0xff]  ;;  %v1211_v6 = vld [vmem:[%s199_s5 + $0x30] sm:$0xff]  ;;  %v271_v32 = vsel %vm263_vm0, %v1199_v2, -inf  ;;  %v272_v33 = vsel %vm263_vm0, %v1201_v3, -inf  ;;  %v864_v43 = vadd.f32 -1.0, %v1199_v2 }
  0x39   : > { %v1213_v7 = vld [vmem:[%s199_s5 + $0x38] sm:$0xff]  ;;  %v255_v8 = vld [vmem:[%s208_s7] sm:$0xff]  ;;  %v256_v9 = vld [vmem:[%s208_s7 + $0x8] sm:$0xff]  ;;  %v266_v30 = vsel %vm263_vm0, %v1205_v4, -inf  ;;  %v268_v31 = vsel %vm263_vm0, %v1211_v6, -inf  ;;  %v273_v34 = vsel %vm263_vm0, %v1207_v5, -inf }
  0x3a   : > { %v257_v10 = vld [vmem:[%s208_s7 + $0x10] sm:$0xff]  ;;  %v1217_v11 = vld [vmem:[%s208_s7 + $0x20] sm:$0xff]  ;;  %v1221_v13 = vld [vmem:[%s208_s7 + $0x18] sm:$0xff]  ;;  %v278_v16 = vsel %vm263_vm0, %v255_v8, -inf  ;;  %v285_v20 = vsel %vm263_vm0, %v256_v9, -inf  ;;  %v275_v35 = vsel %vm263_vm0, %v1213_v7, -inf  ;;  %v267_v38 = vmax.f32 %v264_v28, %v266_v30 }
  0x3b   : > { %500 = vrot.lane.b32.xlu0 %v1199_v2, %s1072_s30  ;;  %504 = vrot.lane.b32.xlu1 %v1201_v3, %s1072_s30  ;;  %v1219_v12 = vld [vmem:[%s208_s7 + $0x30] sm:$0xff]  ;;  %v1223_v14 = vld [vmem:[%s208_s7 + $0x28] sm:$0xff]  ;;  %v279_v17 = vsel %vm263_vm0, %v257_v10, -inf  ;;  %v280_v18 = vsel %vm263_vm0, %v1217_v11, -inf  ;;  %v286_v21 = vsel %vm263_vm0, %v1221_v13, -inf  ;;  %v269_v39 = vmax.f32 %v265_v29, %v268_v31  ;;  %s1074_s20 = smov 127  }
  0x3c   : > { %v1225_v15 = vld [vmem:[%s208_s7 + $0x38] sm:$0xff]  ;;  %v282_v19 = vsel %vm263_vm0, %v1219_v12, -inf  ;;  %v287_v22 = vsel %vm263_vm0, %v1223_v14, -inf  ;;  %v281_v24 = vmax.f32 %v278_v16, %v280_v18  ;;  %v274_v40 = vmax.f32 %v271_v32, %v273_v34  ;;  %p240_p7 = scmp.lt.s32.totalorder %s1058_s12, 1 }
  0x3d   : > { %v289_v23 = vsel %vm263_vm0, %v1225_v15, -inf  ;;  %v283_v25 = vmax.f32 %v279_v17, %v282_v19  ;;  %v288_v26 = vmax.f32 %v285_v20, %v287_v22  ;;  %v276_v41 = vmax.f32 %v272_v33, %v275_v35 }
  0x3e   : > { %v290_v27 = vmax.f32 %v286_v21, %v289_v23  ;;  %v379_v45 = vsub.f32 0.0, %v1199_v2  ;;  %v1266_v48 = vmax.f32 %v267_v38, %v269_v39  ;;  %v865_v55 = vadd.f32 -1.0, %v1195_v1  ;;  %s1482_s12 = smov (!%p240_p7, %s1058_s12), 1 }
  0x3f   : > { %506 = vrot.lane.b32.xlu0 %v1205_v4, %s1072_s30  ;;  %508 = vrot.lane.b32.xlu1 %v1207_v5, %s1072_s30  ;;  %v1256_v36 = vmax.f32 %v281_v24, %v283_v25  ;;  %v1268_v49 = vmax.f32 %v274_v40, %v276_v41  ;;  %v370_v56 = vmax.f32 %v863_v42, 0.0  ;;  %v371_v57 = vmax.f32 %v864_v43, 0.0  ;;  %s858_s28 = sshll.u32 %s1482_s12, 3 }
  0x40   : > { %v1258_v37 = vmax.f32 %v288_v26, %v290_v27  ;;  %v380_v58 = vsub.f32 0.0, %v1195_v1  ;;  %v386_v59 = vmax.f32 %v378_v44, 0.0  ;;  %v387_v60 = vmax.f32 %v379_v45, 0.0  ;;  %s246_s29 = scalar_lea.vmem %s1469_s2, %s858_s28 }
  0x41   : > { %vm292_vm1 = vcmp.gt.f32.partialorder %v1256_v36, 0.8  ;;  %v1281_v62 = vsub.f32 %v1193_v0, %v255_v8  ;;  %v1284_v63 = vsub.f32 %v1199_v2, %v256_v9  ;;  %v1287_v18 = vsub.f32 %v1195_v1, %v257_v10 }
  0x42   : > { %vm293_vm2 = vcmp.gt.f32.partialorder %v1258_v37, 0.8  ;;  %v1271_v51 = vsel %vm292_vm1, 1.0, %v1073_v50  ;;  %v866_v21 = vadd.f32 -1.0, %v1201_v3  ;;  %v381_v23 = vsub.f32 0.0, %v1201_v3 }
  0x43   : > { %510 = vrot.lane.b32.xlu0 %v1211_v6, %s1072_s30  ;;  %512 = vrot.lane.b32.xlu1 %v1213_v7, %s1072_s30  ;;  %v1274_v52 = vsel %vm293_vm2, 1.0, %v1073_v50  ;;  %v312_v19 = vmul.f32 %v1271_v51, %v1266_v48  ;;  %v372_v10 = vmax.f32 %v865_v55, 0.0  ;;  %v388_v24 = vmax.f32 %v380_v58, 0.0 }
  0x44   : > { %v313_v20 = vmul.f32 %v1274_v52, %v1268_v49  ;;  %v394_v25 = vadd.f32 %v386_v59, %v370_v56  ;;  %v395_v26 = vadd.f32 %v387_v60, %v371_v57  ;;  %v1300_v28 = vsub.f32 %v1201_v3, %v1221_v13 }
  0x45   : > { %v354_v29 = vmax.f32 %v1281_v62, 0.0  ;;  %v355_v30 = vmax.f32 %v1284_v63, 0.0  ;;  %v1305_v33 = vsel %vm263_vm0, %v312_v19, 0.0  ;;  %v867_v34 = vadd.f32 -1.0, %v1205_v4 }
  0x46   : > { %v373_v35 = vmax.f32 %v866_v21, 0.0  ;;  %v382_v38 = vsub.f32 0.0, %v1205_v4  ;;  %v389_v41 = vmax.f32 %v381_v23, 0.0  ;;  %v1314_v42 = vsel %vm263_vm0, %v313_v20, 0.0 }
  0x47   : > { %v396_v43 = vadd.f32 %v388_v24, %v372_v10  ;;  %v402_v44 = vmul.f32 0.1, %v394_v25  ;;  %v403_v45 = vmul.f32 0.1, %v395_v26  ;;  %v374_v57 = vmax.f32 %v867_v34, 0.0 }
  0x48   : > { %v383_v58 = vsub.f32 0.0, %v1207_v5  ;;  %v390_v59 = vmax.f32 %v382_v38, 0.0  ;;  %vm595_vm3 = vcmask 1040384   ;;  %v356_v19 = vmax.f32 %v1287_v18, 0.0 }
  0x49   : > { %v869_v20 = vadd.f32 -1.0, %v1211_v6  ;;  %v384_v21 = vsub.f32 0.0, %v1211_v6  ;;  %v599_v23 = vrot.slane %v1195_v1, 7  ;;  %v600_v10 = vrot.slane %v1201_v3, 7 }
  0x4a   : > { %v1332_v24 = vsub.f32 %v1205_v4, %v1217_v11  ;;  %v391_v26 = vmax.f32 %v383_v58, 0.0  ;;  %v1339_v38 = vsub.f32 %v1207_v5, %v1223_v14  ;;  %v1349_v14 = vmul.f32 0.9, %v1256_v36 }
  0x4b   : > { %vm640_vm4 = vcmask 1046528   ;;  %vm662_vm5 = vcmask 129024   ;;  %vm298_vm6 = vcmp.lt.f32.partialorder %v1256_v36, 0.5  ;;  %vm299_vm7 = vcmp.lt.f32.partialorder %v1258_v37, 0.5 }
  0x4c   : > { %vm570_vm8 = vcmask 121856  }
  0xa9   : > { %v499_v46 = vpop.permute.xlu0 %498  ;;  %v503_v47 = vpop.permute.xlu1 %502 }
  0xaa   : > { %v522_v53 = vsub.f32 %v1193_v0, %v499_v46  ;;  %v524_v54 = vsub.f32 %v1195_v1, %v503_v47  ;;  %v868_v47 = vadd.f32 -1.0, %v1207_v5 }
  0xac   : > { %v530_v61 = vand.u32 2147483647, %v522_v53  ;;  %v532_v22 = vand.u32 2147483647, %v524_v54  ;;  %v596_v53 = vrot.slane %v1193_v0, 7  ;;  %v597_v54 = vrot.slane %v1199_v2, 7 }
  0xad   : > { %v501_v16 = vpop.permute.xlu0 %500  ;;  %v505_v17 = vpop.permute.xlu1 %504  ;;  %v375_v25 = vmax.f32 %v868_v47, 0.0  ;;  %v358_v47 = vmax.f32 %v1332_v24, 0.0 }
  0xae   : > { %v523_v8 = vsub.f32 %v1199_v2, %v501_v16  ;;  %546 = vrot.lane.b32.xlu0 %v530_v61, %s1074_s20  ;;  %v525_v9 = vsub.f32 %v1201_v3, %v505_v17  ;;  %v397_v17 = vadd.f32 %v389_v41, %v373_v35  ;;  %v410_v35 = vadd.f32 %v402_v44, %v354_v29 }
  0xaf   : > { %v616_v11 = vsub.f32 %v1193_v0, %v596_v53  ;;  %v385_v41 = vsub.f32 0.0, %v1213_v7  ;;  %v411_v44 = vadd.f32 %v403_v45, %v355_v30  ;;  %v1353_v0 = vsub.f32 %v1211_v6, %v1219_v12 }
  0xb0   : > { %v531_v27 = vand.u32 2147483647, %v523_v8  ;;  %v533_v39 = vand.u32 2147483647, %v525_v9  ;;  %v598_v9 = vsel %vm595_vm3, %v596_v53, %v597_v54  ;;  %v405_v34 = vmul.f32 0.1, %v397_v17 }
  0xb1   : > { %v507_v31 = vpop.permute.xlu0 %506  ;;  %v509_v32 = vpop.permute.xlu1 %508  ;;  %v399_v54 = vadd.f32 %v391_v26, %v375_v25  ;;  %v603_v53 = vrot.slane %v1207_v5, 7  ;;  %v1360_v30 = vmul.f32 0.9, %v1258_v37  ;;  %v419_v17 = vsel %vm263_vm0, %v411_v44, 0.0 }
  0xb2   : > { %550 = vrot.lane.b32.xlu0 %v532_v22, %s1074_s20  ;;  %548 = vrot.lane.b32.xlu1 %v531_v27, %s1074_s20  ;;  %v526_v13 = vsub.f32 %v1205_v4, %v507_v31  ;;  %v527_v40 = vsub.f32 %v1207_v5, %v509_v32  ;;  %v404_v22 = vmul.f32 0.1, %v396_v43  ;;  %v398_v27 = vadd.f32 %v390_v59, %v374_v57 }
  0xb3   : > { %v357_v32 = vmax.f32 %v1300_v28, 0.0  ;;  %v392_v43 = vmax.f32 %v384_v21, 0.0  ;;  %v624_v57 = vand.u32 2147483647, %v616_v11  ;;  %v393_v59 = vmax.f32 %v385_v41, 0.0 }
  0xb4   : > { %v534_v46 = vand.u32 2147483647, %v526_v13  ;;  %v535_v60 = vand.u32 2147483647, %v527_v40  ;;  %v617_v13 = vsub.f32 %v1199_v2, %v598_v9  ;;  %v376_v40 = vmax.f32 %v869_v20, 0.0 }
  0xb5   : > { %v511_v55 = vpop.permute.xlu0 %510  ;;  %v513_v56 = vpop.permute.xlu1 %512  ;;  %v406_v29 = vmul.f32 0.1, %v398_v27  ;;  %v602_v2 = vrot.slane %v1205_v4, 7  ;;  %v412_v12 = vadd.f32 %v404_v22, %v356_v19  ;;  %v407_v20 = vmul.f32 0.1, %v399_v54 }
  0xb6   : > { %552 = vrot.lane.b32.xlu1 %v533_v39, %s1074_s20  ;;  %v528_v61 = vsub.f32 %v1211_v6, %v511_v55  ;;  %554 = vrot.lane.b32.xlu0 %v534_v46, %s1074_s20  ;;  %v529_v16 = vsub.f32 %v1213_v7, %v513_v56  ;;  %v870_v39 = vadd.f32 -1.0, %v1213_v7  ;;  %v601_v46 = vsel %vm595_vm3, %v599_v23, %v600_v10 }
  0xb7   : > { %v618_v55 = vsub.f32 %v1195_v1, %v599_v23  ;;  %v619_v56 = vsub.f32 %v1201_v3, %v601_v46  ;;  %v625_v58 = vand.u32 2147483647, %v617_v13  ;;  %v1367_v1 = vsub.f32 %v1213_v7, %v1225_v15 }
  0xb8   : > { %v536_v8 = vand.u32 2147483647, %v528_v61  ;;  %v537_v31 = vand.u32 2147483647, %v529_v16  ;;  %v377_v45 = vmax.f32 %v870_v39, 0.0  ;;  %v359_v61 = vmax.f32 %v1339_v38, 0.0 }
  0xb9   : > { %v418_v16 = vsel %vm263_vm0, %v410_v35, 0.0  ;;  %v360_v3 = vmax.f32 %v1353_v0, 0.0  ;;  %v604_v21 = vsel %vm595_vm3, %v602_v2, %v603_v53  ;;  %v1371_v9 = vand.u32 2147483647, %v619_v56 }
  0xba   : > { %556 = vrot.lane.b32.xlu1 %v535_v60, %s1074_s20  ;;  %558 = vrot.lane.b32.xlu0 %v536_v8, %s1074_s20  ;;  %v400_v60 = vadd.f32 %v392_v43, %v376_v40  ;;  %v626_v8 = vand.u32 2147483647, %v618_v55  ;;  %v641_v23 = vrot.slane %v624_v57, 1  ;;  %v642_v10 = vrot.slane %v625_v58, 1 }
  0xbb   : > { %v401_v25 = vadd.f32 %v393_v59, %v377_v45  ;;  %v420_v22 = vadd.f32 %v419_v17, %v418_v16  ;;  %v413_v26 = vadd.f32 %v405_v34, %v357_v32  ;;  %v421_v27 = vsel %vm263_vm0, %v412_v12, 0.0 }
  0xbc   : > { %v408_v19 = vmul.f32 0.1, %v400_v60  ;;  %v454_v15 = vand.u32 2147483647, %v1281_v62  ;;  %v456_v35 = vand.u32 2147483647, %v1287_v18  ;;  %v620_v11 = vsub.f32 %v1205_v4, %v602_v2 }
  0xbd   : > { %v457_v39 = vand.u32 2147483647, %v1300_v28  ;;  %v621_v13 = vsub.f32 %v1207_v5, %v604_v21  ;;  %v643_v40 = vsel %vm640_vm4, %v641_v23, %v642_v10  ;;  %v644_v41 = vrot.slane %v626_v8, 1 }
  0xbe   : > { %560 = vrot.lane.b32.xlu1 %v537_v31, %s1074_s20  ;;  %v455_v31 = vand.u32 2147483647, %v1284_v63  ;;  %v645_v43 = vrot.slane %v1371_v9, 1  ;;  %v414_v32 = vadd.f32 %v406_v29, %v358_v47  ;;  %v422_v34 = vadd.f32 %v421_v27, %v420_v22 }
  0xbf   : > { %v605_v62 = vrot.slane %v1211_v6, 7  ;;  %v606_v63 = vrot.slane %v1213_v7, 7  ;;  %v423_v18 = vsel %vm263_vm0, %v413_v26, 0.0  ;;  %v458_v28 = vand.u32 2147483647, %v1332_v24 }
  0xc0   : > { %v459_v4 = vand.u32 2147483647, %v1339_v38  ;;  %v462_v5 = vsel %vm263_vm0, %v454_v15, 0.0  ;;  %v463_v46 = vsel %vm263_vm0, %v456_v35, 0.0  ;;  %v469_v54 = vsel %vm263_vm0, %v455_v31, 0.0 }
  0xc1   : > { %v661_v44 = vsel %vm263_vm0, %v643_v40, 0.0  ;;  %v663_v47 = vsel %vm662_vm5, %v642_v10, 0.0  ;;  %v470_v29 = vsel %vm263_vm0, %v457_v39, 0.0  ;;  %v628_v2 = vand.u32 2147483647, %v620_v11 }
  0xc2   : > { %v629_v53 = vand.u32 2147483647, %v621_v13  ;;  %v646_v55 = vsel %vm640_vm4, %v644_v41, %v645_v43  ;;  %v415_v56 = vadd.f32 %v407_v20, %v359_v61  ;;  %v424_v24 = vadd.f32 %v423_v18, %v422_v34 }
  0xc3   : > { %v425_v38 = vsel %vm263_vm0, %v414_v32, 0.0  ;;  %v607_v57 = vsel %vm595_vm3, %v605_v62, %v606_v63  ;;  %v460_v58 = vand.u32 2147483647, %v1353_v0  ;;  %v461_v45 = vand.u32 2147483647, %v1367_v1 }
  0xc4   : > { %v464_v59 = vadd.f32 %v463_v46, %v462_v5  ;;  %v664_v60 = vadd.f32 %v663_v47, %v661_v44  ;;  %v465_v12 = vsel %vm263_vm0, %v458_v28, 0.0  ;;  %v471_v16 = vadd.f32 %v470_v29, %v469_v54 }
  0xc5   : > { %v472_v17 = vsel %vm263_vm0, %v459_v4, 0.0  ;;  %v665_v21 = vsel %vm263_vm0, %v646_v55, 0.0  ;;  %v622_v61 = vsub.f32 %v1211_v6, %v605_v62  ;;  %v623_v20 = vsub.f32 %v1213_v7, %v607_v57 }
  0xc6   : > { %v647_v8 = vrot.slane %v628_v2, 1  ;;  %v648_v9 = vrot.slane %v629_v53, 1  ;;  %v340_v0 = vsub.f32 %v1266_v48, %v1349_v14  ;;  %v341_v23 = vsub.f32 %v1268_v49, %v1360_v30 }
  0xc7   : > { %v361_v10 = vmax.f32 %v1367_v1, 0.0  ;;  %v409_v22 = vmul.f32 0.1, %v401_v25  ;;  %v416_v26 = vadd.f32 %v408_v19, %v360_v3  ;;  %v426_v27 = vadd.f32 %v425_v38, %v424_v24 }
  0xc8   : > { %v427_v15 = vsel %vm263_vm0, %v415_v56, 0.0  ;;  %v666_v31 = vadd.f32 %v665_v21, %v664_v60  ;;  %v466_v35 = vadd.f32 %v465_v12, %v464_v59  ;;  %v467_v6 = vsel %vm263_vm0, %v460_v58, 0.0 }
  0xc9   : > { %v473_v7 = vadd.f32 %v472_v17, %v471_v16  ;;  %v667_v39 = vsel %vm662_vm5, %v645_v43, 0.0  ;;  %v474_v11 = vsel %vm263_vm0, %v461_v45, 0.0  ;;  %v630_v48 = vand.u32 2147483647, %v622_v61 }
  0xca   : > { %v631_v14 = vand.u32 2147483647, %v623_v20  ;;  %v649_v49 = vsel %vm640_vm4, %v647_v8, %v648_v9  ;;  %v316_v30 = vadd.f32 %v1314_v42, %v1305_v33  ;;  %v342_v1 = vsel %vm263_vm0, %v340_v0, 0.0 }
  0xcb   : > { %v343_v3 = vsel %vm263_vm0, %v341_v23, 0.0  ;;  %v417_v25 = vadd.f32 %v409_v22, %v361_v10  ;;  %v428_v19 = vadd.f32 %v427_v15, %v426_v27  ;;  %v668_v13 = vadd.f32 %v667_v39, %v666_v31 }
  0xcc   : > { %v429_v40 = vsel %vm263_vm0, %v416_v26, 0.0  ;;  %v468_v41 = vadd.f32 %v467_v6, %v466_v35  ;;  %v475_v43 = vadd.f32 %v474_v11, %v473_v7  ;;  %v669_v32 = vsel %vm263_vm0, %v649_v49, 0.0 }
  0xcd   : > { %v861_v34 = vsel %vm298_vm6, 1.0, %v1073_v50  ;;  %v862_v33 = vsel %vm299_vm7, 1.0, %v1073_v50  ;;  %v650_v42 = vrot.slane %v630_v48, 1  ;;  %v651_v62 = vrot.slane %v631_v14, 1 }
  0xce   : > { %v344_v36 = vadd.f32 %v343_v3, %v342_v1  ;;  %v430_v37 = vadd.f32 %v429_v40, %v428_v19  ;;  %v670_v63 = vadd.f32 %v669_v32, %v668_v13  ;;  %v431_v18 = vsel %vm263_vm0, %v417_v25, 0.0 }
  0xcf   : > { %v476_v28 = vmul.f32 %v861_v34, %v468_v41  ;;  %v477_v4 = vmul.f32 %v862_v33, %v475_v43  ;;  %v671_v5 = vsel %vm662_vm5, %v648_v9, 0.0  ;;  %v326_v46 = vsel %vm263_vm0, %v1271_v51, 0.0 }
  0xd0   : > { %v327_v54 = vsel %vm263_vm0, %v1274_v52, 0.0  ;;  %v652_v50 = vsel %vm640_vm4, %v650_v42, %v651_v62  ;;  %v432_v44 = vadd.f32 %v431_v18, %v430_v37  ;;  %v672_v47 = vadd.f32 %v671_v5, %v670_v63 }
  0xd1   : > { %v328_v29 = vadd.f32 %v327_v54, %v326_v46  ;;  %v478_v2 = vsel %vm263_vm0, %v476_v28, 0.0  ;;  %v479_v53 = vsel %vm263_vm0, %v477_v4, 0.0  ;;  %v673_v55 = vsel %vm263_vm0, %v652_v50, 0.0 }
  0xd2   : > { %v442_v56 = vsel %vm263_vm0, %v861_v34, 0.0  ;;  %v443_v24 = vsel %vm263_vm0, %v862_v33, 0.0  ;;  %v480_v51 = vadd.f32 %v479_v53, %v478_v2  ;;  %v674_v38 = vadd.f32 %v673_v55, %v672_v47 }
  0xd3   : > { %v444_v52 = vadd.f32 %v443_v24, %v442_v56  ;;  %v675_v57 = vsel %vm662_vm5, %v651_v62, 0.0 }
  0xd4   : > { %v676_v58 = vadd.f32 %v675_v57, %v674_v38 }
  0xd9   : > { %317 = vadd.xlane.f32.xlu0 %v316_v30 }
  0xdd   : > { %345 = vadd.xlane.f32.xlu0 %v344_v36 }
  0xe1   : > { %433 = vadd.xlane.f32.xlu0 %v432_v44 }
  0xe2   : > { %329 = vadd.xlane.f32.xlu1 %v328_v29 }
  0xe5   : > { %481 = vadd.xlane.f32.xlu0 %v480_v51 }
  0xe6   : > { %445 = vadd.xlane.f32.xlu1 %v444_v52 }
  0xe9   : > { %677 = vadd.xlane.f32.xlu0 %v676_v58 }
 0x120   : > { %v547_v45 = vpop.permute.xlu0 %546 }
 0x121   : > { %v571_v12 = vsel %vm570_vm8, %v547_v45, 0.0 }
 0x124   : > { %v549_v59 = vpop.permute.xlu1 %548  ;;  %v551_v60 = vpop.permute.xlu0 %550 }
 0x125   : > { %v572_v16 = vsel %vm570_vm8, %v549_v59, 0.0  ;;  %v574_v21 = vsel %vm570_vm8, %v551_v60, 0.0 }
 0x126   : > { %v573_v17 = vadd.f32 %v572_v16, %v571_v12 }
 0x128   : > { %v575_v61 = vadd.f32 %v574_v21, %v573_v17  ;;  %v553_v20 = vpop.permute.xlu1 %552  ;;  %v555_v8 = vpop.permute.xlu0 %554 }
 0x129   : > { %v576_v9 = vsel %vm570_vm8, %v553_v20, 0.0  ;;  %v578_v0 = vsel %vm570_vm8, %v555_v8, 0.0 }
 0x12a   : > { %v577_v23 = vadd.f32 %v576_v9, %v575_v61 }
 0x12c   : > { %v579_v10 = vadd.f32 %v578_v0, %v577_v23  ;;  %v557_v22 = vpop.permute.xlu1 %556  ;;  %v559_v26 = vpop.permute.xlu0 %558 }
 0x12d   : > { %v580_v27 = vsel %vm570_vm8, %v557_v22, 0.0  ;;  %v582_v15 = vsel %vm570_vm8, %v559_v26, 0.0  ;;  %v686_v26 = vlaneseq }
 0x12e   : > { %v581_v31 = vadd.f32 %v580_v27, %v579_v10 }
 0x12f   : > { %v687_v27 = vand.u32 127, %v686_v26 }
 0x130   : > { %v583_v35 = vadd.f32 %v582_v15, %v581_v31  ;;  %v561_v6 = vpop.permute.xlu1 %560 }
 0x131   : > { %v584_v7 = vsel %vm570_vm8, %v561_v6, 0.0  ;;  %vm688_vm9 = vcmp.eq.s32.totalorder %v687_v27, 0  ;;  %vm692_vm10 = vcmp.eq.s32.totalorder %v687_v27, 1  ;;  %vm696_vm11 = vcmp.eq.s32.totalorder %v687_v27, 2 }
 0x132   : > { %v585_v39 = vadd.f32 %v584_v7, %v583_v35  ;;  %vm700_vm12 = vcmp.eq.s32.totalorder %v687_v27, 3  ;;  %vm704_vm13 = vcmp.eq.s32.totalorder %v687_v27, 4  ;;  %vm708_vm14 = vcmp.eq.s32.totalorder %v687_v27, 5 }
 0x133   : > { %vm712_vm15 = vcmp.eq.s32.totalorder %v687_v27, 6  ;;  %vm716_vm0 = vcmp.eq.s32.totalorder %v687_v27, 7 }
 0x134   : > { %586 = vadd.xlane.f32.xlu1 %v585_v39 }
 0x162   : > { %v318_v11 = vpop.xlane.xlu0 %317 }
 0x163   : > { %v319_v48 = vrot.slane %v318_v11, 4 }
 0x165   : > { %v320_v14 = vadd.f32 %v319_v48, %v318_v11 }
 0x166   : > { %v346_v49 = vpop.xlane.xlu0 %345 }
 0x167   : > { %v321_v30 = vrot.slane %v320_v14, 2  ;;  %v347_v1 = vrot.slane %v346_v49, 4 }
 0x169   : > { %v348_v3 = vadd.f32 %v347_v1, %v346_v49  ;;  %v322_v25 = vadd.f32 %v321_v30, %v320_v14 }
 0x16a   : > { %v434_v19 = vpop.xlane.xlu0 %433 }
 0x16b   : > { %v330_v13 = vpop.xlane.xlu1 %329  ;;  %v349_v40 = vrot.slane %v348_v3, 2  ;;  %v435_v41 = vrot.slane %v434_v19, 4  ;;  %v323_v43 = vrot.slane %v322_v25, 1 }
 0x16c   : > { %v331_v32 = vrot.slane %v330_v13, 4 }
 0x16d   : > { %v436_v34 = vadd.f32 %v435_v41, %v434_v19  ;;  %v324_v33 = vadd.f32 %v323_v43, %v322_v25  ;;  %v350_v42 = vadd.f32 %v349_v40, %v348_v3 }
 0x16e   : > { %v332_v62 = vadd.f32 %v331_v32, %v330_v13  ;;  %v482_v36 = vpop.xlane.xlu0 %481 }
 0x16f   : > { %v437_v37 = vrot.slane %v436_v34, 2  ;;  %v446_v63 = vpop.xlane.xlu1 %445  ;;  %v483_v18 = vrot.slane %v482_v36, 4  ;;  %875 = vpush %v324_v33  ;;  %v351_v46 = vrot.slane %v350_v42, 1 }
 0x170   : > { %v333_v28 = vrot.slane %v332_v62, 2  ;;  %v447_v4 = vrot.slane %v446_v63, 4 }
 0x171   : > { %v484_v5 = vadd.f32 %v483_v18, %v482_v36  ;;  %v438_v54 = vadd.f32 %v437_v37, %v436_v34  ;;  %v352_v55 = vadd.f32 %v351_v46, %v350_v42 }
 0x172   : > { %v448_v50 = vadd.f32 %v447_v4, %v446_v63  ;;  %v334_v44 = vadd.f32 %v333_v28, %v332_v62  ;;  %v678_v59 = vpop.xlane.xlu0 %677 }
 0x173   : > { %v485_v47 = vrot.slane %v484_v5, 2  ;;  %v439_v29 = vrot.slane %v438_v54, 1  ;;  %v679_v60 = vrot.slane %v678_v59, 4 }
 0x174   : > { %v449_v2 = vrot.slane %v448_v50, 2  ;;  %v335_v53 = vrot.slane %v334_v44, 1 }
 0x175   : > { %v486_v56 = vadd.f32 %v485_v47, %v484_v5  ;;  %v440_v51 = vadd.f32 %v439_v29, %v438_v54  ;;  %v680_v12 = vadd.f32 %v679_v60, %v678_v59 }
 0x176   : > { %v336_v24 = vadd.f32 %v335_v53, %v334_v44  ;;  %v450_v38 = vadd.f32 %v449_v2, %v448_v50 }
 0x177   : > { %v487_v52 = vrot.slane %v486_v56, 1  ;;  %v681_v16 = vrot.slane %v680_v12, 2 }
 0x178   : > { %877 = vpush %v336_v24  ;;  %v451_v57 = vrot.slane %v450_v38, 1 }
 0x179   : > { %879 = vpush %v352_v55  ;;  %v488_v58 = vadd.f32 %v487_v52, %v486_v56  ;;  %v682_v20 = vadd.f32 %v681_v16, %v680_v12 }
 0x17a   : > { %881 = vpush %v440_v51  ;;  %v452_v45 = vadd.f32 %v451_v57, %v450_v38 }
 0x17b   : > { %v683_v0 = vrot.slane %v682_v20, 1 }
 0x17c   : > { %883 = vpush %v452_v45 }
 0x17d   : > { %885 = vpush %v488_v58  ;;  %v684_v22 = vadd.f32 %v683_v0, %v682_v20 }
 0x1a0   : > { %s876_s8 = spop %875 }
 0x1a1   : > { %v689_v15 = vstv %s876_s8 }
 0x1a2   : > { %v690_v35 = vsel %vm688_vm9, %v689_v15, 0.0 }
 0x1a9   : > { %s878_s9 = spop %877 }
 0x1aa   : > { %v693_v31 = vstv %s878_s9  ;;  %s880_s15 = spop %879 }
 0x1ab   : > { %v694_v6 = vsel %vm692_vm10, %v693_v31, 0.0  ;;  %v697_v7 = vstv %s880_s15  ;;  %s882_s17 = spop %881 }
 0x1ac   : > { %v695_v39 = vadd.f32 %v694_v6, %v690_v35  ;;  %v698_v11 = vsel %vm696_vm11, %v697_v7, 0.0  ;;  %v701_v48 = vstv %s882_s17 }
 0x1ad   : > { %s884_s18 = spop %883  ;;  %v702_v49 = vsel %vm700_vm12, %v701_v48, 0.0 }
 0x1ae   : > { %v699_v14 = vadd.f32 %v698_v11, %v695_v39  ;;  %v705_v30 = vstv %s884_s18  ;;  %s886_s19 = spop %885 }
 0x1af   : > { %v706_v3 = vsel %vm704_vm13, %v705_v30, 0.0  ;;  %v709_v25 = vstv %s886_s19 }
 0x1b0   : > { %v703_v1 = vadd.f32 %v702_v49, %v699_v14  ;;  %v710_v13 = vsel %vm708_vm14, %v709_v25, 0.0 }
 0x1b2   : > { %v707_v19 = vadd.f32 %v706_v3, %v703_v1 }
 0x1b4   : > { %v711_v40 = vadd.f32 %v710_v13, %v707_v19 }
 0x1bd   : > { %v587_v17 = vpop.xlane.xlu1 %586 }
 0x1be   : > { %v588_v21 = vrot.slane %v587_v17, 4 }
 0x1c0   : > { %v589_v61 = vadd.f32 %v588_v21, %v587_v17 }
 0x1c2   : > { %v590_v8 = vrot.slane %v589_v61, 2 }
 0x1c4   : > { %v591_v9 = vadd.f32 %v590_v8, %v589_v61 }
 0x1c6   : > { %v592_v23 = vrot.slane %v591_v9, 1 }
 0x1c8   : > { %v593_v10 = vadd.f32 %v592_v23, %v591_v9 }
 0x1ca   : > { %887 = vpush %v593_v10 }
 0x1cb   : > { %889 = vpush %v684_v22 }
 0x1fb   : > { %s888_s25 = spop %887 }
 0x1fc   : > { %v713_v41 = vstv %s888_s25  ;;  %s890_s26 = spop %889 }
 0x1fd   : > { %v714_v43 = vsel %vm712_vm15, %v713_v41, 0.0  ;;  %v717_v32 = vstv %s890_s26 }
 0x1fe   : > { %v715_v34 = vadd.f32 %v714_v43, %v711_v40  ;;  %v718_v33 = vsel %vm716_vm0, %v717_v32, 0.0 }
 0x200   : > { %v719_v42 = vadd.f32 %v718_v33, %v715_v34 }
 0x202   : > { %727 = vst [vmem:[%s246_s29] sm:$0xff] %v719_v42 }
 0x203 PF: > { %s18_s14 = sadd.s32 1, %s1066_s14   ;;  %s1474_s9 = smov %s1050_s10 }
 0x204   : > { %p15_p9 = scmp.ge.s32.totalorder %s18_s14, 4   ;;  %s1475_s10 = smov %s1054_s11 }
 0x205   : > { %s1476_s11 = smov %s1139_s21  ;;  %s1477_s12 = smov %s1062_s13 }
 0x206   : > { %s1478_s13 = smov %s1480_s16  ;;  %17 = sbr.rel (!%p15_p9) target bundleno = 6 (0x6), region = 85 }
 0x20b   :  { %753 = vsyncpa [#allocation3], 1 }
 0x20c   :  { %755 = vsyncpa [#allocation3 + $0x1], 1 }
 0x20d   :  { %756 = vsyncpa [#allocation5], 1 }
 0x20e   :  { %758 = vsyncpa [#allocation5 + $0x1], 1 }

</bundles_post_ra>
